<compile_context>
chip_gen: v5e
topology: v5e:2x2
jax: 0.10.0
libtpu: 0.0.40
codegen_flags: <defaults>
</compile_context>

<pallas_src>
import functools
import math

import jax
import jax.numpy as jnp
from jax.experimental import pallas as pl
from jax.experimental.pallas import tpu as pltpu

BN_EPS = 1e-5


# ----------------------------------------------------------------------------
# Fused Pallas kernel: conv1 + bn1 + relu + maxpool, one image per grid step
# ----------------------------------------------------------------------------
def _stem_kernel(xw_ref, w_ref, bias_ref, o_ref, y_ref, *, tph):
    """xw_ref : (Hs*2*PW, 48) bf16 -- kw-unrolled space-to-depth input rows,
                                      row index = (s2d_row, col_parity, col_pair)
       w_ref  : (192, C)      bf16 -- BN-scale-folded weights, K = (ki, kj, ch12)
       bias_ref:(1, C)        f32  -- beta - running_mean * scale
       o_ref  : (PH, PW, C)   f32  -- pooled output
       y_ref  : (PH, 2, 2, PW, C) f32 scratch -- conv+bn+relu output laid out as
                (pool_row, row_parity, col_parity, col_pair, channel)
    """
    ph_tot, _, _, pw_tot, cout = y_ref.shape
    wrow = 2 * pw_tot                 # lhs rows per conv-output row
    m_blk = 2 * tph * wrow            # lhs rows per conv-row block
    n_blk = ph_tot // tph

    # ---- conv1 + bn1 + relu: 4 matmuls (one per kh tap) per row block ------
    for blk in range(n_blk):
        r0 = 2 * blk * tph            # first conv-output row of this block
        acc = None
        for ki in range(4):
            lhs = xw_ref[(r0 + ki) * wrow:(r0 + ki + 2 * tph) * wrow, :]
            d = jnp.dot(lhs, w_ref[ki * 48:(ki + 1) * 48, :],
                        preferred_element_type=jnp.float32)
            acc = d if acc is None else acc + d
        y = jnp.maximum(acc + bias_ref[...], 0.0)
        y_ref[blk * tph:(blk + 1) * tph] = y.reshape(tph, 2, 2, pw_tot, cout)

    # ---- 3x3 / stride-2 / pad-1 max pool ------------------------------------
    # Post-ReLU values are >= 0, so the padded row/col is equivalent to a zero
    # entry inside the max.
    y00 = y_ref[:, 0, 0]              # conv row 2*ph,   col 2*pw
    y01 = y_ref[:, 0, 1]              # conv row 2*ph,   col 2*pw + 1
    y10 = y_ref[:, 1, 0]              # conv row 2*ph+1, col 2*pw
    y11 = y_ref[:, 1, 1]              # conv row 2*ph+1, col 2*pw + 1

    zc = jnp.zeros((ph_tot, 1, cout), dtype=jnp.float32)
    # max over columns {2*pw-1, 2*pw, 2*pw+1} for each of the two row parities
    w0 = jnp.maximum(jnp.maximum(y00, y01),
                     jnp.concatenate([zc, y01[:, :-1, :]], axis=1))
    w1 = jnp.maximum(jnp.maximum(y10, y11),
                     jnp.concatenate([zc, y11[:, :-1, :]], axis=1))
    # max over rows {2*ph-1, 2*ph, 2*ph+1}  (row 2*ph-1 = previous pair's odd row)
    zr = jnp.zeros((1, pw_tot, cout), dtype=jnp.float32)
    up = jnp.concatenate([zr, w1[:-1]], axis=0)
    o_ref[...] = jnp.maximum(jnp.maximum(w0, w1), up)


# ----------------------------------------------------------------------------
# JAX wrapper (NCHW in / NCHW out, PyTorch convention)
# ----------------------------------------------------------------------------
def front_model_forward(x_nchw, conv_w, gamma, beta, run_mean, run_var):
    n, cin, h, w = x_nchw.shape
    cout = conv_w.shape[0]
    assert cin == 3 and conv_w.shape[1:] == (3, 7, 7), conv_w.shape
    assert h % 4 == 0 and w % 4 == 0 and h >= 8 and w >= 8, (h, w)

    ho, wo = h // 2, w // 2            # conv1 output spatial
    ph, pw = ho // 2, wo // 2          # maxpool output spatial
    hs, ws = ho + 3, wo + 3            # space-to-depth spatial

    # ---- XLA glue: pad + 2x2 space-to-depth + kw-unroll (bf16, ~4x input) ---
    x = jnp.transpose(x_nchw, (0, 2, 3, 1)).astype(jnp.bfloat16)    # NHWC
    # The 7x7 kernel is zero-padded to 8x8 at the top/left, so the input is
    # padded (4, 2) instead of (3, 3): the window of conv-output row oh is then
    # padded rows [2*oh, 2*oh+8) == space-to-depth rows [oh, oh+4).
    xp = jnp.pad(x, ((0, 0), (4, 2), (4, 2), (0, 0)))
    xs = xp.reshape(n, hs, 2, ws, 2, 3)
    xs = jnp.transpose(xs, (0, 1, 3, 2, 4, 5)).reshape(n, hs, ws, 12)
    # unroll the 4 kw taps of the (now 4x4 stride-1) conv along channels
    xw = jnp.concatenate([xs[:, :, kj:kj + wo, :] for kj in range(4)], axis=-1)
    # split W into (col_pair, parity) and put parity in front of the pair so
    # the fused pool only needs contiguous slices; then flatten for the kernel
    xw = xw.reshape(n, hs, pw, 2, 48).transpose(0, 1, 3, 2, 4)
    xw = xw.reshape(n, hs * 2 * pw, 48)

    # ---- fold BN scale into the weights; build (192, Cout) matmul weights ---
    scale = gamma * jax.lax.rsqrt(run_var + BN_EPS)                  # (Cout,)
    bias = (beta - run_mean * scale).reshape(1, cout).astype(jnp.float32)
    w8 = jnp.pad(conv_w, ((0, 0), (0, 0), (1, 0), (1, 0)))           # (C,3,8,8)
    w8 = w8.reshape(cout, 3, 4, 2, 4, 2)                             # o,c,ki,dy,kj,dx
    w_mat = jnp.transpose(w8, (2, 4, 3, 5, 1, 0)).reshape(192, cout)  # (ki,kj,dy,dx,c)
    w_mat = (w_mat * scale[None, :]).astype(jnp.bfloat16)

    tph = math.gcd(ph, 8)              # pooled rows per in-kernel row block

    pooled = pl.pallas_call(
        functools.partial(_stem_kernel, tph=tph),
        out_shape=jax.ShapeDtypeStruct((n, ph, pw, cout), jnp.float32),
        grid=(n,),
        in_specs=[
            pl.BlockSpec((None, hs * 2 * pw, 48), lambda b: (b, 0, 0)),
            pl.BlockSpec((192, cout), lambda b: (0, 0)),
            pl.BlockSpec((1, cout), lambda b: (0, 0)),
        ],
        out_specs=pl.BlockSpec((None, ph, pw, cout), lambda b: (b, 0, 0, 0)),
        scratch_shapes=[pltpu.VMEM((ph, 2, 2, pw, cout), jnp.float32)],
        compiler_params=pltpu.CompilerParams(
            dimension_semantics=("parallel",),
            vmem_limit_bytes=48 * 1024 * 1024),
    )(xw, w_mat, bias)

    return jnp.transpose(pooled, (0, 3, 1, 2))     # back to NCHW


# ----------------------------------------------------------------------------
# Pure-JAX reference (for correctness check)
# ----------------------------------------------------------------------------
def reference_forward(x_nchw, conv_w, gamma, beta, run_mean, run_var):
    y = jax.lax.conv_general_dilated(
        x_nchw, conv_w, window_strides=(2, 2), padding=((3, 3), (3, 3)),
        dimension_numbers=("NCHW", "OIHW", "NCHW"))
    scale = gamma / jnp.sqrt(run_var + BN_EPS)
    bias = beta - run_mean * scale
    y = y * scale[None, :, None, None] + bias[None, :, None, None]
    y = jnp.maximum(y, 0.0)
    y = jax.lax.reduce_window(
        y, -jnp.inf, jax.lax.max,
        window_dimensions=(1, 1, 3, 3), window_strides=(1, 1, 2, 2),
        padding=((0, 0), (0, 0), (1, 1), (1, 1)))
    return y


# ----------------------------------------------------------------------------
# Main
# ----------------------------------------------------------------------------
if __name__ == "__main__":
    key = jax.random.PRNGKey(0)
    k_x, k_w, k_g, k_b, k_m, k_v = jax.random.split(key, 6)

    # Small shapes consistent with the module: conv1 requires Cin=3.
    N, CIN, H, W = 2, 3, 32, 32
    COUT = 64

    x = jax.random.normal(k_x, (N, CIN, H, W), jnp.float32)
    conv_w = jax.random.normal(k_w, (COUT, CIN, 7, 7), jnp.float32) * 0.05
    gamma = jax.random.uniform(k_g, (COUT,), jnp.float32, 0.5, 1.5)
    beta = jax.random.normal(k_b, (COUT,), jnp.float32) * 0.1
    run_mean = jax.random.normal(k_m, (COUT,), jnp.float32) * 0.1
    run_var = jax.random.uniform(k_v, (COUT,), jnp.float32, 0.5, 1.5)

    out = jax.block_until_ready(
        front_model_forward(x, conv_w, gamma, beta, run_mean, run_var))

    ref = reference_forward(x, conv_w, gamma, beta, run_mean, run_var)
    # conv: 32x32 -> 16x16, pool: 16x16 -> 8x8
    assert out.shape == ref.shape == (N, COUT, H // 4, W // 4), (out.shape, ref.shape)
    max_err = float(jnp.max(jnp.abs(out - ref)))
    # bf16 matmul operands -> loosened tolerance vs f32 reference.
    assert jnp.allclose(out, ref, rtol=2e-2, atol=2e-2), max_err

    print("KERNEL_OK")
</pallas_src>

<mosaic_0001>
module attributes {stable_mosaic.version = 11 : i64} {
  func.func @_stem_kernel(%arg0: i32, %arg1: memref<1x304x48xbf16, #tpu.memory_space<vmem>>, %arg2: memref<192x64xbf16, #tpu.memory_space<vmem>>, %arg3: memref<1x64xf32, #tpu.memory_space<vmem>>, %arg4: memref<1x8x8x64xf32, #tpu.memory_space<vmem>>, %arg5: memref<8x2x2x8x64xf32, #tpu.memory_space<vmem>>) attributes {dimension_semantics = [#tpu.dimension_semantics<parallel>], iteration_bounds = array<i64: 2>, scalar_prefetch = 0 : i64, scratch_operands = 1 : i64, tpu.core_type = #tpu.core_type<tc>, window_params = [{transform_indices = @transform_0, window_bounds = array<i64: 1, 304, 48>}, {pipeline_mode = #tpu.pipeline_mode<synchronous>, transform_indices = @transform_1, window_bounds = array<i64: 192, 64>}, {pipeline_mode = #tpu.pipeline_mode<synchronous>, transform_indices = @transform_2, window_bounds = array<i64: 1, 64>}, {transform_indices = @transform_3, window_bounds = array<i64: 1, 8, 8, 64>}]} {
    %c0 = arith.constant 0 : index
    %c0_0 = arith.constant 0 : index
    %c0_1 = arith.constant 0 : index
    %0 = vector.load %arg1[%c0, %c0_0, %c0_1] : memref<1x304x48xbf16, #tpu.memory_space<vmem>>, vector<1x256x48xbf16>
    %1 = vector.shape_cast %0 : vector<1x256x48xbf16> to vector<256x48xbf16>
    %c0_2 = arith.constant 0 : index
    %c0_3 = arith.constant 0 : index
    %2 = vector.load %arg2[%c0_2, %c0_3] : memref<192x64xbf16, #tpu.memory_space<vmem>>, vector<48x64xbf16>
    %cst = arith.constant dense<0.000000e+00> : vector<256x64xf32>
    %3 = tpu.matmul %1, %2, %cst {dimension_numbers = #tpu.dot_dimension_numbers<[1], [0], [0], [1], [0, 0, 1, 1], [], []>} : vector<256x48xbf16>, vector<48x64xbf16>, vector<256x64xf32> -> vector<256x64xf32>
    %c0_4 = arith.constant 0 : index
    %c16 = arith.constant 16 : index
    %c0_5 = arith.constant 0 : index
    %4 = vector.load %arg1[%c0_4, %c16, %c0_5] : memref<1x304x48xbf16, #tpu.memory_space<vmem>>, vector<1x256x48xbf16>
    %5 = vector.shape_cast %4 : vector<1x256x48xbf16> to vector<256x48xbf16>
    %c48 = arith.constant 48 : index
    %c0_6 = arith.constant 0 : index
    %6 = vector.load %arg2[%c48, %c0_6] : memref<192x64xbf16, #tpu.memory_space<vmem>>, vector<48x64xbf16>
    %cst_7 = arith.constant dense<0.000000e+00> : vector<256x64xf32>
    %7 = tpu.matmul %5, %6, %cst_7 {dimension_numbers = #tpu.dot_dimension_numbers<[1], [0], [0], [1], [0, 0, 1, 1], [], []>} : vector<256x48xbf16>, vector<48x64xbf16>, vector<256x64xf32> -> vector<256x64xf32>
    %8 = arith.addf %3, %7 : vector<256x64xf32>
    %c0_8 = arith.constant 0 : index
    %c32 = arith.constant 32 : index
    %c0_9 = arith.constant 0 : index
    %9 = vector.load %arg1[%c0_8, %c32, %c0_9] : memref<1x304x48xbf16, #tpu.memory_space<vmem>>, vector<1x256x48xbf16>
    %10 = vector.shape_cast %9 : vector<1x256x48xbf16> to vector<256x48xbf16>
    %c96 = arith.constant 96 : index
    %c0_10 = arith.constant 0 : index
    %11 = vector.load %arg2[%c96, %c0_10] : memref<192x64xbf16, #tpu.memory_space<vmem>>, vector<48x64xbf16>
    %cst_11 = arith.constant dense<0.000000e+00> : vector<256x64xf32>
    %12 = tpu.matmul %10, %11, %cst_11 {dimension_numbers = #tpu.dot_dimension_numbers<[1], [0], [0], [1], [0, 0, 1, 1], [], []>} : vector<256x48xbf16>, vector<48x64xbf16>, vector<256x64xf32> -> vector<256x64xf32>
    %13 = arith.addf %8, %12 : vector<256x64xf32>
    %c0_12 = arith.constant 0 : index
    %c48_13 = arith.constant 48 : index
    %c0_14 = arith.constant 0 : index
    %14 = vector.load %arg1[%c0_12, %c48_13, %c0_14] : memref<1x304x48xbf16, #tpu.memory_space<vmem>>, vector<1x256x48xbf16>
    %15 = vector.shape_cast %14 : vector<1x256x48xbf16> to vector<256x48xbf16>
    %c144 = arith.constant 144 : index
    %c0_15 = arith.constant 0 : index
    %16 = vector.load %arg2[%c144, %c0_15] : memref<192x64xbf16, #tpu.memory_space<vmem>>, vector<48x64xbf16>
    %cst_16 = arith.constant dense<0.000000e+00> : vector<256x64xf32>
    %17 = tpu.matmul %15, %16, %cst_16 {dimension_numbers = #tpu.dot_dimension_numbers<[1], [0], [0], [1], [0, 0, 1, 1], [], []>} : vector<256x48xbf16>, vector<48x64xbf16>, vector<256x64xf32> -> vector<256x64xf32>
    %18 = arith.addf %13, %17 : vector<256x64xf32>
    %c0_17 = arith.constant 0 : index
    %c0_18 = arith.constant 0 : index
    %19 = vector.load %arg3[%c0_17, %c0_18] : memref<1x64xf32, #tpu.memory_space<vmem>>, vector<1x64xf32>
    %20 = vector.broadcast %19 : vector<1x64xf32> to vector<256x64xf32>
    %21 = arith.addf %18, %20 : vector<256x64xf32>
    %cst_19 = arith.constant 0.000000e+00 : f32
    %22 = vector.broadcast %cst_19 : f32 to vector<256x64xf32>
    %23 = arith.maximumf %21, %22 : vector<256x64xf32>
    %24 = vector.shape_cast %23 : vector<256x64xf32> to vector<8x2x2x8x64xf32>
    %c0_20 = arith.constant 0 : index
    %c0_21 = arith.constant 0 : index
    %c0_22 = arith.constant 0 : index
    %c0_23 = arith.constant 0 : index
    %c0_24 = arith.constant 0 : index
    %25 = vector.load %arg5[%c0_20, %c0_21, %c0_22, %c0_23, %c0_24] : memref<8x2x2x8x64xf32, #tpu.memory_space<vmem>>, vector<8x2x2x8x64xf32>
    tpu.vector_store %arg5[%c0_20, %c0_21, %c0_22, %c0_23, %c0_24], %24 {strides = array<i32>} : memref<8x2x2x8x64xf32, #tpu.memory_space<vmem>>, vector<8x2x2x8x64xf32>,
    %c0_25 = arith.constant 0 : index
    %c0_26 = arith.constant 0 : index
    %c0_27 = arith.constant 0 : index
    %c0_28 = arith.constant 0 : index
    %c0_29 = arith.constant 0 : index
    %26 = vector.load %arg5[%c0_25, %c0_26, %c0_27, %c0_28, %c0_29] : memref<8x2x2x8x64xf32, #tpu.memory_space<vmem>>, vector<8x1x1x8x64xf32>
    %27 = vector.shape_cast %26 : vector<8x1x1x8x64xf32> to vector<8x8x64xf32>
    %c0_30 = arith.constant 0 : index
    %c0_31 = arith.constant 0 : index
    %c1 = arith.constant 1 : index
    %c0_32 = arith.constant 0 : index
    %c0_33 = arith.constant 0 : index
    %28 = vector.load %arg5[%c0_30, %c0_31, %c1, %c0_32, %c0_33] : memref<8x2x2x8x64xf32, #tpu.memory_space<vmem>>, vector<8x1x1x8x64xf32>
    %29 = vector.shape_cast %28 : vector<8x1x1x8x64xf32> to vector<8x8x64xf32>
    %c0_34 = arith.constant 0 : index
    %c1_35 = arith.constant 1 : index
    %c0_36 = arith.constant 0 : index
    %c0_37 = arith.constant 0 : index
    %c0_38 = arith.constant 0 : index
    %30 = vector.load %arg5[%c0_34, %c1_35, %c0_36, %c0_37, %c0_38] : memref<8x2x2x8x64xf32, #tpu.memory_space<vmem>>, vector<8x1x1x8x64xf32>
    %31 = vector.shape_cast %30 : vector<8x1x1x8x64xf32> to vector<8x8x64xf32>
    %c0_39 = arith.constant 0 : index
    %c1_40 = arith.constant 1 : index
    %c1_41 = arith.constant 1 : index
    %c0_42 = arith.constant 0 : index
    %c0_43 = arith.constant 0 : index
    %32 = vector.load %arg5[%c0_39, %c1_40, %c1_41, %c0_42, %c0_43] : memref<8x2x2x8x64xf32, #tpu.memory_space<vmem>>, vector<8x1x1x8x64xf32>
    %33 = vector.shape_cast %32 : vector<8x1x1x8x64xf32> to vector<8x8x64xf32>
    %cst_44 = arith.constant 0.000000e+00 : f32
    %34 = vector.broadcast %cst_44 : f32 to vector<8x1x64xf32>
    %35 = arith.maximumf %27, %29 : vector<8x8x64xf32>
    %36 = vector.extract_strided_slice %29 {offsets = [0, 0, 0], sizes = [8, 7, 64], strides = [1, 1, 1]} : vector<8x8x64xf32> to vector<8x7x64xf32>
    %37 = tpu.concatenate %34, %36 in 1 : vector<8x1x64xf32>, vector<8x7x64xf32> -> vector<8x8x64xf32>
    %38 = arith.maximumf %35, %37 : vector<8x8x64xf32>
    %39 = arith.maximumf %31, %33 : vector<8x8x64xf32>
    %40 = vector.extract_strided_slice %33 {offsets = [0, 0, 0], sizes = [8, 7, 64], strides = [1, 1, 1]} : vector<8x8x64xf32> to vector<8x7x64xf32>
    %41 = tpu.concatenate %34, %40 in 1 : vector<8x1x64xf32>, vector<8x7x64xf32> -> vector<8x8x64xf32>
    %42 = arith.maximumf %39, %41 : vector<8x8x64xf32>
    %cst_45 = arith.constant 0.000000e+00 : f32
    %43 = vector.broadcast %cst_45 : f32 to vector<1x8x64xf32>
    %44 = vector.extract_strided_slice %42 {offsets = [0, 0, 0], sizes = [7, 8, 64], strides = [1, 1, 1]} : vector<8x8x64xf32> to vector<7x8x64xf32>
    %45 = tpu.concatenate %43, %44 in 0 : vector<1x8x64xf32>, vector<7x8x64xf32> -> vector<8x8x64xf32>
    %46 = arith.maximumf %38, %42 : vector<8x8x64xf32>
    %47 = arith.maximumf %46, %45 : vector<8x8x64xf32>
    %c0_46 = arith.constant 0 : index
    %c0_47 = arith.constant 0 : index
    %c0_48 = arith.constant 0 : index
    %c0_49 = arith.constant 0 : index
    %48 = vector.load %arg4[%c0_46, %c0_47, %c0_48, %c0_49] : memref<1x8x8x64xf32, #tpu.memory_space<vmem>>, vector<1x8x8x64xf32>
    %49 = vector.shape_cast %48 : vector<1x8x8x64xf32> to vector<8x8x64xf32>
    %50 = vector.shape_cast %47 : vector<8x8x64xf32> to vector<1x8x8x64xf32>
    tpu.vector_store %arg4[%c0_46, %c0_47, %c0_48, %c0_49], %50 {strides = array<i32>} : memref<1x8x8x64xf32, #tpu.memory_space<vmem>>, vector<1x8x8x64xf32>,
    return
  }
  func.func @transform_0(%arg0: i32) -> (i32, i32, i32) {
    %c0_i32 = arith.constant 0 : i32
    %c0_i32_0 = arith.constant 0 : i32
    %c0_i32_1 = arith.constant 0 : i32
    return %arg0, %c0_i32, %c0_i32_0 : i32, i32, i32
  }
  func.func @transform_1(%arg0: i32) -> (i32, i32) {
    %c0_i32 = arith.constant 0 : i32
    %c0_i32_0 = arith.constant 0 : i32
    %c0_i32_1 = arith.constant 0 : i32
    return %c0_i32, %c0_i32_0 : i32, i32
  }
  func.func @transform_2(%arg0: i32) -> (i32, i32) {
    %c0_i32 = arith.constant 0 : i32
    %c0_i32_0 = arith.constant 0 : i32
    %c0_i32_1 = arith.constant 0 : i32
    return %c0_i32, %c0_i32_0 : i32, i32
  }
  func.func @transform_3(%arg0: i32) -> (i32, i32, i32, i32) {
    %c0_i32 = arith.constant 0 : i32
    %c0_i32_0 = arith.constant 0 : i32
    %c0_i32_1 = arith.constant 0 : i32
    %c0_i32_2 = arith.constant 0 : i32
    return %arg0, %c0_i32, %c0_i32_0, %c0_i32_1 : i32, i32, i32, i32
  }
}

</mosaic_0001>

<bundles_post_ra>
// kernel: tpu_custom_call.1
= control target key start
LH: loop header
LB: loop body
LE: loop exit
PB: predicated region body
PF: predicated region fallthrough
CT: control target
= control target key end

     0   :  { %8 = vsyncpa [#allocation4], 0  ;;  %s2378_s0 = inlined_call_operand.vmem [shape: bf16[2,304,48], index: 0, kind: input, shape index: {}]   ;;  %s2379_s1 = inlined_call_operand.vmem [shape: bf16[192,64], index: 1, kind: input, shape index: {}]   ;;  %s2380_s2 = inlined_call_operand.vmem [shape: f32[1,64], index: 2, kind: input, shape index: {}]   ;;  %s2381_s3 = inlined_call_operand.hbm [shape: f32[2,8,8,64], index: 3, kind: output, shape index: {}]  }
   0x1   :  { %10 = vsyncpa [#allocation4 + $0x1], 0  ;;  %s2022_s12 = smov 0   ;;  %s2024_s13 = smov 0  }
   0x2   :  { %s2026_s14 = smov 0   ;;  %s2028_s15 = smov 0  }
   0x3 LB: > { %s2043_s16 = sadd.s32 4294967295, %s1998_s15   ;;  %s1512_s17 = sadd.s32 4294967294, %s1998_s15   ;;  %s1998_s15 = sphi %s2028_s15, %s2387_s15   ;;  %s1994_s14 = sphi %s2026_s14, %s2386_s14   ;;  %s1990_s13 = sphi %s2024_s13, %s2385_s13   ;;  %s1986_s12 = sphi %s2022_s12, %s2384_s12  }
   0x4   : > { %s2047_s18 = sadd.s32 1, %s1998_s15   ;;  %s91_s19 = sadd.s32 1, %s1994_s14 }
   0x5   : > { %s88_s20 = ssub.s32 %s1998_s15, %s2047_s18  ;;  %p101_p0 = scmp.ne.s32.totalorder %s1994_s14, %s1990_s13 }
   0x6   : > { %p89_p1 = scmp.eq.s32.totalorder %s88_s20, 0  ;;  %p102_p2 = scmp.eq.s32.totalorder %s2043_s16, 1 }
   0x7   : > { %p107_p3 = scmp.ne.s32.totalorder %s1990_s13, %s1986_s12  ;;  %p108_p4 = scmp.eq.s32.totalorder %s1512_s17, 1 }
   0x8   : > { %s2058_s21 = scalar_select %p89_p1, %s1994_s14, %s91_s19  }
   0x9   : > { %p2060_p5 = por %p102_p2, %p101_p0  ;;  %p2064_p6 = por %p108_p4, %p107_p3 }
   0xa   : > { %p1515_p7 = scmp.ge.s32.totalorder %s1998_s15, 1  ;;  %p140_p8 = scmp.lt.s32.totalorder %s1998_s15, 3 }
   0xc   : > { %p141_p9 = pnand %p1515_p7, %p140_p8 }
   0xd   : > { %p164_p10 = scmp.lt.s32.totalorder (!%p141_p9), %s2043_s16, 1  ;;  %s161_s10 = sand.u32 (!%p141_p9), 1, %s1990_s13  }
   0xe   : > { %144 = sbr.rel (%p141_p9) target bundleno = 441 (0x1b9), region = 32  ;;  %s1516_s11 = sshll.u32 (!%p141_p9), %s161_s10, 6 }
   0xf   : > { %s2223_s17 = scalar_lea.vmem (!%p141_p9), [#allocation3], %s1516_s11  ;;  %s1892_s19 = sshll.u32 (!%p141_p9), %s2043_s16, 6 }
  0x10   : > { %s1446_s25 = scalar_lea.hbm (!%p141_p9), %s2381_s3, %s1892_s19  ;;  %s1435_s27 = scalar_lea.sflag (!%p141_p9), [#allocation4], %s161_s10 }
  0x11   : > { %s1449_s26 = sshll.u32 (!%p141_p9), %s1446_s25, 4  ;;  %s1956_s5 = scalar_lea.hbm (!%p141_p9), %s2381_s3, 128  ;;  %s1450_s26 = int_to_ptr.hbm [resolvable:$true] %s1449_s26 }
  0x12   : > { %s1950_s28 = sshra.s32 (!%p141_p9), %s1450_s26, 4  ;;  %s1951_s28 = int_to_ptr.hbm [resolvable:$true] %s1950_s28 }
  0x13   : > { %v1853_v0 = vld [vmem:[%s2379_s1 + $0x28] sm:$0xff]  ;;  %v1849_v1 = vld [vmem:[%s2379_s1 + $0x10] sm:$0xff]  ;;  %v1872_v2 = vld [vmem:[%s2379_s1 + $0x40] sm:$0xff]  ;;  %s165_s9 = scalar_select %p164_p10, %s2043_s16, 1  ;;  %vm314_vm0 = vcmask 392192   ;;  %vm1245_vm1 = vcmask 523264  }
  0x14   : > { %v1891_v3 = vld [vmem:[%s2379_s1 + $0x58] sm:$0xff]  ;;  %368 = vmatpush.bf16.msra.mxu0 %v1853_v0  ;;  %483 = vmatpush.bf16.msra.mxu1 %v1849_v1  ;;  %v1852_v4 = vld [vmem:[%s2379_s1 + $0x20] sm:$0xff]  ;;  %v1848_v5 = vld [vmem:[%s2379_s1 + $0x8] sm:$0xff]  ;;  %vm1345_vm2 = vcmask 1040384   ;;  %s1447_s16 = sshll.u32 %s2223_s17, 4  ;;  %s1952_s29 = scalar_lea.hbm %s1951_s28, 64  ;;  %s1448_s16 = int_to_ptr.vmem [resolvable:$true] %s1447_s16 }
  0x15   : > { %756 = vmatpush.bf16.msra.mxu2 %v1872_v2  ;;  %1061 = vmatpush.bf16.msra.mxu3 %v1891_v3  ;;  %v1871_v6 = vld [vmem:[%s2379_s1 + $0x38] sm:$0xff]  ;;  %v1890_v7 = vld [vmem:[%s2379_s1 + $0x50] sm:$0xff]  ;;  %s1893_s20 = smul.u32 152, %s165_s9  ;;  %v1847_v9 = vld [vmem:[%s2379_s1] sm:$0xff]  ;;  %p1953_p11 = scmp.ne.s32.totalorder %s1951_s28, %s1952_s29 }
  0x16   : > { %v1851_v8 = vld [vmem:[%s2379_s1 + $0x18] sm:$0xff]  ;;  %v1870_v10 = vld [vmem:[%s2379_s1 + $0x30] sm:$0xff]  ;;  %v1889_v11 = vld [vmem:[%s2379_s1 + $0x48] sm:$0xff]  ;;  %p1957_p0 = scmp.lt.s32.totalorder %s1951_s28, %s2381_s3  ;;  %p1958_p1 = scmp.lt.s32.totalorder %s1956_s5, %s1952_s29 }
  0x17   : > { %s2105_s30 = scalar_lea.vmem %s2378_s0, %s1893_s20  ;;  %v2180_v46 = vld [vmem:[%s2380_s2] ss:$0 sm:$0xff]  ;;  %p1954_p12 = pnand %p1953_p11, %p2060_p5 }
  0x18   : > { %369 = vmatpush.bf16.msra.mxu0 %v1852_v4  ;;  %484 = vmatpush.bf16.msra.mxu1 %v1848_v5  ;;  %v1832_v12 = vld [vmem:[%s2105_s30 + $0x8] sm:$0xff]  ;;  %v1831_v13 = vld [vmem:[%s2105_s30] sm:$0xff]  ;;  %v1854_v14 = vld [vmem:[%s2105_s30 + $0x10] sm:$0xff]  ;;  %p1959_p2 = por %p1958_p1, %p1957_p0 }
  0x19   : > { %757 = vmatpush.bf16.msra.mxu2 %v1871_v6  ;;  %1062 = vmatpush.bf16.msra.mxu3 %v1890_v7  ;;  %v1873_v15 = vld [vmem:[%s2105_s30 + $0x18] sm:$0xff]  ;;  %v1833_v16 = vld [vmem:[%s2105_s30 + $0x10] sm:$0xff]  ;;  %v1874_v18 = vld [vmem:[%s2105_s30 + $0x20] sm:$0xff]  ;;  %p1955_p13 = pneg %p1954_p12 }
  0x1a   : > { %v1855_v17 = vld [vmem:[%s2105_s30 + $0x18] sm:$0xff]  ;;  %v1856_v20 = vld [vmem:[%s2105_s30 + $0x20] sm:$0xff]  ;;  %v1875_v21 = vld [vmem:[%s2105_s30 + $0x28] sm:$0xff] }
  0x1b   : > { %v1834_v19 = vld [vmem:[%s2105_s30 + $0x18] sm:$0xff]  ;;  %v1835_v22 = vld [vmem:[%s2105_s30 + $0x20] sm:$0xff]  ;;  %v1857_v23 = vld [vmem:[%s2105_s30 + $0x28] sm:$0xff]  ;;  %p1960_p3 = pnand %p1959_p2, %p1955_p13 }
  0x1c   : > { %370 = vmatpush.bf16.msra.mxu0 %v1851_v8  ;;  %485 = vmatpush.bf16.msra.mxu1 %v1847_v9  ;;  %v1876_v24 = vld [vmem:[%s2105_s30 + $0x30] sm:$0xff]  ;;  %v1836_v25 = vld [vmem:[%s2105_s30 + $0x28] sm:$0xff]  ;;  %v1877_v27 = vld [vmem:[%s2105_s30 + $0x38] sm:$0xff] }
  0x1d   : > { %758 = vmatpush.bf16.msra.mxu2 %v1870_v10  ;;  %1063 = vmatpush.bf16.msra.mxu3 %v1889_v11  ;;  %v1858_v26 = vld [vmem:[%s2105_s30 + $0x30] sm:$0xff]  ;;  %v1859_v29 = vld [vmem:[%s2105_s30 + $0x38] sm:$0xff]  ;;  %v1878_v30 = vld [vmem:[%s2105_s30 + $0x40] sm:$0xff] }
  0x1e   : > { %v1837_v28 = vld [vmem:[%s2105_s30 + $0x30] sm:$0xff]  ;;  %v1838_v31 = vld [vmem:[%s2105_s30 + $0x38] sm:$0xff]  ;;  %v1860_v32 = vld [vmem:[%s2105_s30 + $0x40] sm:$0xff] }
  0x1f   : > { %1594 = vmatmul.msk.bf16.vlgmr.msra.gmra.mxu0 %vm314_vm0, %v1832_v12  ;;  %1626 = vmatmul.msk.bf16.vlgmr.msra.gmra.mxu1 %vm314_vm0, %v1831_v13  ;;  %v1879_v33 = vld [vmem:[%s2105_s30 + $0x48] sm:$0xff]  ;;  %v1839_v34 = vld [vmem:[%s2105_s30 + $0x40] sm:$0xff]  ;;  %v1880_v36 = vld [vmem:[%s2105_s30 + $0x50] sm:$0xff] }
  0x20   : > { %1718 = vmatmul.msk.bf16.vlgmr.msra.gmra.mxu2 %vm314_vm0, %v1854_v14  ;;  %1810 = vmatmul.msk.bf16.vlgmr.msra.gmra.mxu3 %vm314_vm0, %v1873_v15  ;;  %v1861_v35 = vld [vmem:[%s2105_s30 + $0x48] sm:$0xff]  ;;  %v1862_v40 = vld [vmem:[%s2105_s30 + $0x50] sm:$0xff]  ;;  %v1881_v41 = vld [vmem:[%s2105_s30 + $0x58] sm:$0xff] }
  0x21   : > { %v1840_v37 = vld [vmem:[%s2105_s30 + $0x48] sm:$0xff]  ;;  %v1841_v55 = vld [vmem:[%s2105_s30 + $0x50] sm:$0xff]  ;;  %v1863_v59 = vld [vmem:[%s2105_s30 + $0x58] sm:$0xff] }
  0x22   : > { %v1882_v60 = vld [vmem:[%s2105_s30 + $0x60] sm:$0xff] }
  0x2f   : > { %1595 = vmatmul.msk.bf16.gmra.mxu0 %vm314_vm0, %v1833_v16  ;;  %1627 = vmatmul.msk.bf16.gmra.mxu1 %vm314_vm0, %v1832_v12  ;;  %v1842_v12 = vld [vmem:[%s2105_s30 + $0x58] sm:$0xff] }
  0x30   : > { %1719 = vmatmul.msk.bf16.gmra.mxu2 %vm314_vm0, %v1855_v17  ;;  %1811 = vmatmul.msk.bf16.gmra.mxu3 %vm314_vm0, %v1874_v18  ;;  %v1883_v17 = vld [vmem:[%s2105_s30 + $0x68] sm:$0xff] }
  0x3f   : > { %1596 = vmatmul.msk.bf16.gmra.mxu0 %vm314_vm0, %v1834_v19  ;;  %1628 = vmatmul.msk.bf16.gmra.mxu1 %vm314_vm0, %v1833_v16  ;;  %v1864_v16 = vld [vmem:[%s2105_s30 + $0x60] sm:$0xff] }
  0x40   : > { %1720 = vmatmul.msk.bf16.gmra.mxu2 %vm314_vm0, %v1856_v20  ;;  %1812 = vmatmul.msk.bf16.gmra.mxu3 %vm314_vm0, %v1875_v21 }
  0x4f   : > { %1597 = vmatmul.msk.bf16.gmra.mxu0 %vm314_vm0, %v1835_v22  ;;  %1629 = vmatmul.msk.bf16.gmra.mxu1 %vm314_vm0, %v1834_v19 }
  0x50   : > { %1721 = vmatmul.msk.bf16.gmra.mxu2 %vm314_vm0, %v1857_v23  ;;  %1813 = vmatmul.msk.bf16.gmra.mxu3 %vm314_vm0, %v1876_v24 }
  0x5f   : > { %1598 = vmatmul.msk.bf16.gmra.mxu0 %vm314_vm0, %v1836_v25  ;;  %1630 = vmatmul.msk.bf16.gmra.mxu1 %vm314_vm0, %v1835_v22 }
  0x60   : > { %1722 = vmatmul.msk.bf16.gmra.mxu2 %vm314_vm0, %v1858_v26  ;;  %1814 = vmatmul.msk.bf16.gmra.mxu3 %vm314_vm0, %v1877_v27 }
  0x6f   : > { %1599 = vmatmul.msk.bf16.gmra.mxu0 %vm314_vm0, %v1837_v28  ;;  %1631 = vmatmul.msk.bf16.gmra.mxu1 %vm314_vm0, %v1836_v25 }
  0x70   : > { %1723 = vmatmul.msk.bf16.gmra.mxu2 %vm314_vm0, %v1859_v29  ;;  %1815 = vmatmul.msk.bf16.gmra.mxu3 %vm314_vm0, %v1878_v30 }
  0x7f   : > { %1600 = vmatmul.msk.bf16.gmra.mxu0 %vm314_vm0, %v1838_v31  ;;  %1632 = vmatmul.msk.bf16.gmra.mxu1 %vm314_vm0, %v1837_v28 }
  0x80   : > { %1724 = vmatmul.msk.bf16.gmra.mxu2 %vm314_vm0, %v1860_v32  ;;  %1816 = vmatmul.msk.bf16.gmra.mxu3 %vm314_vm0, %v1879_v33 }
  0x8f   : > { %1601 = vmatmul.msk.bf16.gmra.mxu0 %vm314_vm0, %v1839_v34  ;;  %1633 = vmatmul.msk.bf16.gmra.mxu1 %vm314_vm0, %v1838_v31 }
  0x90   : > { %1725 = vmatmul.msk.bf16.gmra.mxu2 %vm314_vm0, %v1861_v35  ;;  %1817 = vmatmul.msk.bf16.gmra.mxu3 %vm314_vm0, %v1880_v36 }
  0x9c   : > { %v372_v38 = vpop.f32.mrf.mxu0  ;;  %v487_v39 = vpop.f32.mrf.mxu1 }
  0x9d   : > { %v488_v42 = vadd.f32 %v487_v39, %v372_v38  ;;  %v1843_v39 = vld [vmem:[%s2105_s30 + $0x60] sm:$0xff] }
  0x9f   : > { %1602 = vmatmul.msk.bf16.gmra.mxu0 %vm314_vm0, %v1840_v37  ;;  %1634 = vmatmul.msk.bf16.gmra.mxu1 %vm314_vm0, %v1839_v34 }
  0xa0   : > { %1726 = vmatmul.msk.bf16.gmra.mxu2 %vm314_vm0, %v1862_v40  ;;  %1818 = vmatmul.msk.bf16.gmra.mxu3 %vm314_vm0, %v1881_v41 }
  0xa3   : > { %v760_v43 = vpop.f32.mrf.mxu2  ;;  %v1065_v44 = vpop.f32.mrf.mxu3 }
  0xa4   : > { %v840_v45 = vadd.f32 %v760_v43, %v488_v42  ;;  %v374_v47 = vpop.f32.mrf.mxu0  ;;  %v489_v48 = vpop.f32.mrf.mxu1 }
  0xa5   : > { %v490_v52 = vadd.f32 %v489_v48, %v374_v47  ;;  %v1865_v47 = vld [vmem:[%s2105_s30 + $0x68] sm:$0xff]  ;;  %v1884_v48 = vld [vmem:[%s2105_s30 + $0x70] sm:$0xff] }
  0xa6   : > { %v1145_v49 = vadd.f32 %v1065_v44, %v840_v45 }
  0xa8   : > { %v1181_v50 = vadd.f32 %v2180_v46, %v1145_v49 }
  0xaa   : > { %v1213_v51 = vmax.f32 %v1181_v50, 0.0 }
  0xab   : > { %v762_v53 = vpop.f32.mrf.mxu2  ;;  %v1067_v54 = vpop.f32.mrf.mxu3 }
  0xac   : > { %1246 = vst.msk [vmem:[#allocation2] sm:$0xff] %vm1245_vm1, %v1213_v51  ;;  %v841_v56 = vadd.f32 %v762_v53, %v490_v52  ;;  %v377_v57 = vpop.f32.mrf.mxu0  ;;  %v492_v58 = vpop.f32.mrf.mxu1 }
  0xad   : > { %v493_v63 = vadd.f32 %v492_v58, %v377_v57 }
  0xae   : > { %v1146_v61 = vadd.f32 %v1067_v54, %v841_v56 }
  0xaf   : > { %1603 = vmatmul.msk.bf16.gmra.mxu0 %vm314_vm0, %v1841_v55  ;;  %1635 = vmatmul.msk.bf16.gmra.mxu1 %vm314_vm0, %v1840_v37 }
  0xb0   : > { %v1182_v62 = vadd.f32 %v2180_v46, %v1146_v61  ;;  %1727 = vmatmul.msk.bf16.gmra.mxu2 %vm314_vm0, %v1863_v59  ;;  %1819 = vmatmul.msk.bf16.gmra.mxu3 %vm314_vm0, %v1882_v60 }
  0xb2   : > { %v1214_v0 = vmax.f32 %v1182_v62, 0.0 }
  0xb3   : > { %v765_v1 = vpop.f32.mrf.mxu2  ;;  %v1070_v2 = vpop.f32.mrf.mxu3  ;;  %v1278_v31 = vld [vmem:[#allocation2] sm:$0xff] }
  0xb4   : > { %1247 = vst.msk [vmem:[#allocation2 + $0x8] sm:$0xff] %vm1245_vm1, %v1214_v0  ;;  %v842_v3 = vadd.f32 %v765_v1, %v493_v63  ;;  %v379_v4 = vpop.f32.mrf.mxu0  ;;  %v494_v5 = vpop.f32.mrf.mxu1 }
  0xb5   : > { %v495_v9 = vadd.f32 %v494_v5, %v379_v4  ;;  %v1844_v5 = vld [vmem:[%s2105_s30 + $0x68] sm:$0xff] }
  0xb6   : > { %v1147_v6 = vadd.f32 %v1070_v2, %v842_v3 }
  0xb8   : > { %v1183_v7 = vadd.f32 %v2180_v46, %v1147_v6 }
  0xba   : > { %v1215_v8 = vmax.f32 %v1183_v7, 0.0 }
  0xbb   : > { %v767_v10 = vpop.f32.mrf.mxu2  ;;  %v1072_v11 = vpop.f32.mrf.mxu3  ;;  %v1287_v27 = vld [vmem:[#allocation2 + $0x8] sm:$0xff] }
  0xbc   : > { %1248 = vst.msk [vmem:[#allocation2 + $0x10] sm:$0xff] %vm1245_vm1, %v1215_v8  ;;  %v843_v13 = vadd.f32 %v767_v10, %v495_v9  ;;  %v382_v14 = vpop.f32.mrf.mxu0  ;;  %v497_v15 = vpop.f32.mrf.mxu1  ;;  %v1329_v29 = vrot.slane %v1287_v27, 7  ;;  %v1313_v34 = vmax.f32 %v1278_v31, %v1287_v27  ;;  %v1866_v9 = vld [vmem:[%s2105_s30 + $0x70] sm:$0xff]  ;;  %v1885_v10 = vld [vmem:[%s2105_s30 + $0x78] sm:$0xff] }
  0xbd   : > { %v498_v20 = vadd.f32 %v497_v15, %v382_v14 }
  0xbe   : > { %v1148_v18 = vadd.f32 %v1072_v11, %v843_v13  ;;  %v1346_v40 = vsel %vm1345_vm2, 0.0, %v1329_v29 }
  0xbf   : > { %1604 = vmatmul.msk.bf16.gmra.mxu0 %vm314_vm0, %v1842_v12  ;;  %1636 = vmatmul.msk.bf16.gmra.mxu1 %vm314_vm0, %v1841_v55  ;;  %v1354_v51 = vmax.f32 %v1313_v34, %v1346_v40  ;;  %v1886_v40 = vld [vmem:[%s2105_s30 + $0x80] sm:$0xff] }
  0xc0   : > { %v1184_v19 = vadd.f32 %v2180_v46, %v1148_v18  ;;  %1728 = vmatmul.msk.bf16.gmra.mxu2 %vm314_vm0, %v1864_v16  ;;  %1820 = vmatmul.msk.bf16.gmra.mxu3 %vm314_vm0, %v1883_v17 }
  0xc2   : > { %v1216_v21 = vmax.f32 %v1184_v19, 0.0 }
  0xc3   : > { %v770_v22 = vpop.f32.mrf.mxu2  ;;  %v1075_v23 = vpop.f32.mrf.mxu3  ;;  %v1296_v35 = vld [vmem:[#allocation2 + $0x10] sm:$0xff] }
  0xc4   : > { %1249 = vst.msk [vmem:[#allocation2 + $0x18] sm:$0xff] %vm1245_vm1, %v1216_v21  ;;  %v844_v24 = vadd.f32 %v770_v22, %v498_v20  ;;  %v384_v25 = vpop.f32.mrf.mxu0  ;;  %v499_v26 = vpop.f32.mrf.mxu1 }
  0xc5   : > { %v500_v33 = vadd.f32 %v499_v26, %v384_v25 }
  0xc6   : > { %v1149_v28 = vadd.f32 %v1075_v23, %v844_v24 }
  0xc8   : > { %v1185_v30 = vadd.f32 %v2180_v46, %v1149_v28 }
  0xca   : > { %v1217_v32 = vmax.f32 %v1185_v30, 0.0 }
  0xcb   : > { %v1305_v36 = vld [vmem:[#allocation2 + $0x18] sm:$0xff]  ;;  %v772_v37 = vpop.f32.mrf.mxu2  ;;  %v1077_v38 = vpop.f32.mrf.mxu3 }
  0xcc   : > { %v1362_v41 = vmax.f32 %v1296_v35, %v1305_v36  ;;  %v1378_v42 = vrot.slane %v1305_v36, 7  ;;  %1250 = vst.msk [vmem:[#allocation2 + $0x20] sm:$0xff] %vm1245_vm1, %v1217_v32  ;;  %v845_v43 = vadd.f32 %v772_v37, %v500_v33  ;;  %v387_v44 = vpop.f32.mrf.mxu0  ;;  %v502_v45 = vpop.f32.mrf.mxu1  ;;  %v1845_v32 = vld [vmem:[%s2105_s30 + $0x70] sm:$0xff] }
  0xcd   : > { %v503_v54 = vadd.f32 %v502_v45, %v387_v44 }
  0xce   : > { %v1394_v49 = vsel %vm1345_vm2, 0.0, %v1378_v42  ;;  %v1150_v50 = vadd.f32 %v1077_v38, %v845_v43 }
  0xcf   : > { %v2212_v52 = vmax.f32 %v1362_v41, %v1394_v49  ;;  %1605 = vmatmul.msk.bf16.gmra.mxu0 %vm314_vm0, %v1843_v39  ;;  %1637 = vmatmul.msk.bf16.gmra.mxu1 %vm314_vm0, %v1842_v12 }
  0xd0   : > { %v1186_v53 = vadd.f32 %v2180_v46, %v1150_v50  ;;  %1729 = vmatmul.msk.bf16.gmra.mxu2 %vm314_vm0, %v1865_v47  ;;  %1821 = vmatmul.msk.bf16.gmra.mxu3 %vm314_vm0, %v1884_v48 }
  0xd1   : > { %v1410_v55 = vmax.f32 %v1354_v51, %v2212_v52 }
  0xd2   : > { %v1218_v56 = vmax.f32 %v1186_v53, 0.0 }
  0xd3   : > { %v1418_v57 = vmax.f32 %v1410_v55, 0.0  ;;  %v775_v58 = vpop.f32.mrf.mxu2  ;;  %v1080_v59 = vpop.f32.mrf.mxu3  ;;  %v1279_v24 = vld [vmem:[#allocation2 + $0x20] sm:$0xff] }
  0xd4   : > { %1251 = vst.msk [vmem:[#allocation2 + $0x28] sm:$0xff] %vm1245_vm1, %v1218_v56  ;;  %v846_v60 = vadd.f32 %v775_v58, %v503_v54  ;;  %v389_v61 = vpop.f32.mrf.mxu0  ;;  %v504_v62 = vpop.f32.mrf.mxu1 }
  0xd5   : > { %1426 = vst.msk [vmem:[%s2223_s17] sm:$0xff] %vm1245_vm1, %v1418_v57  ;;  %v505_v2 = vadd.f32 %v504_v62, %v389_v61 }
  0xd6   : > { %v1151_v63 = vadd.f32 %v1080_v59, %v846_v60 }
  0xd8   : > { %v1187_v0 = vadd.f32 %v2180_v46, %v1151_v63  ;;  %v1846_v63 = vld [vmem:[%s2105_s30 + $0x78] sm:$0xff] }
  0xda   : > { %v1219_v1 = vmax.f32 %v1187_v0, 0.0 }
  0xdb   : > { %v777_v3 = vpop.f32.mrf.mxu2  ;;  %v1082_v4 = vpop.f32.mrf.mxu3  ;;  %v1288_v20 = vld [vmem:[#allocation2 + $0x28] sm:$0xff] }
  0xdc   : > { %1252 = vst.msk [vmem:[#allocation2 + $0x30] sm:$0xff] %vm1245_vm1, %v1219_v1  ;;  %v847_v6 = vadd.f32 %v777_v3, %v505_v2  ;;  %v392_v7 = vpop.f32.mrf.mxu0  ;;  %v507_v8 = vpop.f32.mrf.mxu1  ;;  %v1330_v22 = vrot.slane %v1288_v20, 7  ;;  %v1314_v27 = vmax.f32 %v1279_v24, %v1288_v20  ;;  %v1868_v2 = vld [vmem:[%s2105_s30 + $0x80] sm:$0xff]  ;;  %v1887_v3 = vld [vmem:[%s2105_s30 + $0x88] sm:$0xff] }
  0xdd   : > { %v508_v13 = vadd.f32 %v507_v8, %v392_v7 }
  0xde   : > { %v1152_v11 = vadd.f32 %v1082_v4, %v847_v6  ;;  %v1347_v33 = vsel %vm1345_vm2, 0.0, %v1330_v22 }
  0xdf   : > { %1606 = vmatmul.msk.bf16.gmra.mxu0 %vm314_vm0, %v1844_v5  ;;  %1638 = vmatmul.msk.bf16.gmra.mxu1 %vm314_vm0, %v1843_v39  ;;  %v1867_v39 = vld [vmem:[%s2105_s30 + $0x78] sm:$0xff]  ;;  %v1355_v43 = vmax.f32 %v1314_v27, %v1347_v33  ;;  %v1888_v33 = vld [vmem:[%s2105_s30 + $0x90] sm:$0xff] }
  0xe0   : > { %v1188_v12 = vadd.f32 %v2180_v46, %v1152_v11  ;;  %1730 = vmatmul.msk.bf16.gmra.mxu2 %vm314_vm0, %v1866_v9  ;;  %1822 = vmatmul.msk.bf16.gmra.mxu3 %vm314_vm0, %v1885_v10 }
  0xe2   : > { %v1220_v14 = vmax.f32 %v1188_v12, 0.0 }
  0xe3   : > { %v780_v15 = vpop.f32.mrf.mxu2  ;;  %v1085_v16 = vpop.f32.mrf.mxu3  ;;  %v1297_v28 = vld [vmem:[#allocation2 + $0x30] sm:$0xff] }
  0xe4   : > { %1253 = vst.msk [vmem:[#allocation2 + $0x38] sm:$0xff] %vm1245_vm1, %v1220_v14  ;;  %v848_v17 = vadd.f32 %v780_v15, %v508_v13  ;;  %v394_v18 = vpop.f32.mrf.mxu0  ;;  %v509_v19 = vpop.f32.mrf.mxu1 }
  0xe5   : > { %v510_v26 = vadd.f32 %v509_v19, %v394_v18 }
  0xe6   : > { %v1153_v21 = vadd.f32 %v1085_v16, %v848_v17 }
  0xe8   : > { %v1189_v23 = vadd.f32 %v2180_v46, %v1153_v21 }
  0xea   : > { %v1221_v25 = vmax.f32 %v1189_v23, 0.0 }
  0xeb   : > { %v1306_v29 = vld [vmem:[#allocation2 + $0x38] sm:$0xff]  ;;  %v782_v30 = vpop.f32.mrf.mxu2  ;;  %v1087_v31 = vpop.f32.mrf.mxu3 }
  0xec   : > { %v1363_v34 = vmax.f32 %v1297_v28, %v1306_v29  ;;  %v1379_v35 = vrot.slane %v1306_v29, 7  ;;  %1254 = vst.msk [vmem:[#allocation2 + $0x40] sm:$0xff] %vm1245_vm1, %v1221_v25  ;;  %v849_v36 = vadd.f32 %v782_v30, %v510_v26  ;;  %v397_v37 = vpop.f32.mrf.mxu0  ;;  %v512_v38 = vpop.f32.mrf.mxu1  ;;  %v1850_v25 = vld [vmem:[%s2105_s30 + $0x80] sm:$0xff] }
  0xed   : > { %v513_v47 = vadd.f32 %v512_v38, %v397_v37 }
  0xee   : > { %v1395_v41 = vsel %vm1345_vm2, 0.0, %v1379_v35  ;;  %v1154_v42 = vadd.f32 %v1087_v31, %v849_v36 }
  0xef   : > { %v2245_v44 = vmax.f32 %v1363_v34, %v1395_v41  ;;  %1607 = vmatmul.msk.bf16.gmra.mxu0 %vm314_vm0, %v1845_v32  ;;  %1639 = vmatmul.msk.bf16.gmra.mxu1 %vm314_vm0, %v1844_v5 }
  0xf0   : > { %v1190_v45 = vadd.f32 %v2180_v46, %v1154_v42  ;;  %1731 = vmatmul.msk.bf16.gmra.mxu2 %vm314_vm0, %v1867_v39  ;;  %1823 = vmatmul.msk.bf16.gmra.mxu3 %vm314_vm0, %v1886_v40 }
  0xf1   : > { %v1411_v48 = vmax.f32 %v1355_v43, %v2245_v44 }
  0xf2   : > { %v1222_v49 = vmax.f32 %v1190_v45, 0.0 }
  0xf3   : > { %v1419_v50 = vmax.f32 %v1411_v48, %v2212_v52  ;;  %v785_v51 = vpop.f32.mrf.mxu2  ;;  %v1090_v53 = vpop.f32.mrf.mxu3  ;;  %v1280_v17 = vld [vmem:[#allocation2 + $0x40] sm:$0xff] }
  0xf4   : > { %1255 = vst.msk [vmem:[#allocation2 + $0x48] sm:$0xff] %vm1245_vm1, %v1222_v49  ;;  %v850_v54 = vadd.f32 %v785_v51, %v513_v47  ;;  %v399_v55 = vpop.f32.mrf.mxu0  ;;  %v514_v56 = vpop.f32.mrf.mxu1 }
  0xf5   : > { %1427 = vst.msk [vmem:[%s2223_s17 + $0x8] sm:$0xff] %vm1245_vm1, %v1419_v50  ;;  %v515_v60 = vadd.f32 %v514_v56, %v399_v55 }
  0xf6   : > { %v1155_v57 = vadd.f32 %v1090_v53, %v850_v54 }
  0xf8   : > { %v1191_v58 = vadd.f32 %v2180_v46, %v1155_v57 }
  0xfa   : > { %v1223_v59 = vmax.f32 %v1191_v58, 0.0 }
  0xfb   : > { %v787_v61 = vpop.f32.mrf.mxu2  ;;  %v1092_v62 = vpop.f32.mrf.mxu3  ;;  %v1289_v13 = vld [vmem:[#allocation2 + $0x48] sm:$0xff] }
  0xfc   : > { %1256 = vst.msk [vmem:[#allocation2 + $0x50] sm:$0xff] %vm1245_vm1, %v1223_v59  ;;  %v851_v52 = vadd.f32 %v787_v61, %v515_v60  ;;  %v402_v0 = vpop.f32.mrf.mxu0  ;;  %v517_v1 = vpop.f32.mrf.mxu1  ;;  %v1331_v15 = vrot.slane %v1289_v13, 7  ;;  %v1315_v20 = vmax.f32 %v1280_v17, %v1289_v13 }
  0xfd   : > { %v518_v6 = vadd.f32 %v517_v1, %v402_v0 }
  0xfe   : > { %v1156_v4 = vadd.f32 %v1092_v62, %v851_v52  ;;  %v1348_v26 = vsel %vm1345_vm2, 0.0, %v1331_v15 }
  0xff   : > { %1608 = vmatmul.msk.bf16.gmra.mxu0 %vm314_vm0, %v1846_v63  ;;  %1640 = vmatmul.msk.bf16.gmra.mxu1 %vm314_vm0, %v1845_v32  ;;  %v1869_v32 = vld [vmem:[%s2105_s30 + $0x88] sm:$0xff]  ;;  %v1356_v36 = vmax.f32 %v1315_v20, %v1348_v26 }
 0x100   : > { %v1192_v5 = vadd.f32 %v2180_v46, %v1156_v4  ;;  %1732 = vmatmul.msk.bf16.gmra.mxu2 %vm314_vm0, %v1868_v2  ;;  %1824 = vmatmul.msk.bf16.gmra.mxu3 %vm314_vm0, %v1887_v3 }
 0x102   : > { %v1224_v7 = vmax.f32 %v1192_v5, 0.0 }
 0x103   : > { %v790_v8 = vpop.f32.mrf.mxu2  ;;  %v1095_v9 = vpop.f32.mrf.mxu3  ;;  %v1298_v21 = vld [vmem:[#allocation2 + $0x50] sm:$0xff] }
 0x104   : > { %1257 = vst.msk [vmem:[#allocation2 + $0x58] sm:$0xff] %vm1245_vm1, %v1224_v7  ;;  %v852_v10 = vadd.f32 %v790_v8, %v518_v6  ;;  %v404_v11 = vpop.f32.mrf.mxu0  ;;  %v519_v12 = vpop.f32.mrf.mxu1 }
 0x105   : > { %v520_v19 = vadd.f32 %v519_v12, %v404_v11 }
 0x106   : > { %v1157_v14 = vadd.f32 %v1095_v9, %v852_v10 }
 0x108   : > { %v1193_v16 = vadd.f32 %v2180_v46, %v1157_v14 }
 0x10a   : > { %v1225_v18 = vmax.f32 %v1193_v16, 0.0 }
 0x10b   : > { %v1307_v22 = vld [vmem:[#allocation2 + $0x58] sm:$0xff]  ;;  %v792_v23 = vpop.f32.mrf.mxu2  ;;  %v1097_v24 = vpop.f32.mrf.mxu3 }
 0x10c   : > { %v1364_v27 = vmax.f32 %v1298_v21, %v1307_v22  ;;  %v1380_v28 = vrot.slane %v1307_v22, 7  ;;  %1258 = vst.msk [vmem:[#allocation2 + $0x60] sm:$0xff] %vm1245_vm1, %v1225_v18  ;;  %v853_v29 = vadd.f32 %v792_v23, %v520_v19  ;;  %v407_v30 = vpop.f32.mrf.mxu0  ;;  %v522_v31 = vpop.f32.mrf.mxu1 }
 0x10d   : > { %v523_v39 = vadd.f32 %v522_v31, %v407_v30 }
 0x10e   : > { %v1396_v34 = vsel %vm1345_vm2, 0.0, %v1380_v28  ;;  %v1158_v35 = vadd.f32 %v1097_v24, %v853_v29 }
 0x10f   : > { %v2275_v37 = vmax.f32 %v1364_v27, %v1396_v34  ;;  %1609 = vmatmul.msk.bf16.gmra.mxu0 %vm314_vm0, %v1850_v25  ;;  %1641 = vmatmul.msk.bf16.gmra.mxu1 %vm314_vm0, %v1846_v63 }
 0x110   : > { %v1194_v38 = vadd.f32 %v2180_v46, %v1158_v35  ;;  %1733 = vmatmul.msk.bf16.gmra.mxu2 %vm314_vm0, %v1869_v32  ;;  %1825 = vmatmul.msk.bf16.gmra.mxu3 %vm314_vm0, %v1888_v33 }
 0x111   : > { %v1412_v40 = vmax.f32 %v1356_v36, %v2275_v37 }
 0x112   : > { %v1226_v41 = vmax.f32 %v1194_v38, 0.0 }
 0x113   : > { %v1420_v42 = vmax.f32 %v1412_v40, %v2245_v44  ;;  %v795_v43 = vpop.f32.mrf.mxu2  ;;  %v1100_v45 = vpop.f32.mrf.mxu3  ;;  %v1281_v7 = vld [vmem:[#allocation2 + $0x60] sm:$0xff] }
 0x114   : > { %1259 = vst.msk [vmem:[#allocation2 + $0x68] sm:$0xff] %vm1245_vm1, %v1226_v41  ;;  %v854_v47 = vadd.f32 %v795_v43, %v523_v39  ;;  %v409_v48 = vpop.f32.mrf.mxu0  ;;  %v524_v49 = vpop.f32.mrf.mxu1 }
 0x115   : > { %1428 = vst.msk [vmem:[%s2223_s17 + $0x10] sm:$0xff] %vm1245_vm1, %v1420_v42  ;;  %v525_v54 = vadd.f32 %v524_v49, %v409_v48 }
 0x116   : > { %v1159_v50 = vadd.f32 %v1100_v45, %v854_v47 }
 0x118   : > { %v1195_v51 = vadd.f32 %v2180_v46, %v1159_v50 }
 0x11a   : > { %v1227_v53 = vmax.f32 %v1195_v51, 0.0 }
 0x11b   : > { %v797_v55 = vpop.f32.mrf.mxu2  ;;  %v1102_v56 = vpop.f32.mrf.mxu3  ;;  %v1290_v3 = vld [vmem:[#allocation2 + $0x68] sm:$0xff] }
 0x11c   : > { %1260 = vst.msk [vmem:[#allocation2 + $0x70] sm:$0xff] %vm1245_vm1, %v1227_v53  ;;  %v855_v57 = vadd.f32 %v797_v55, %v525_v54  ;;  %v412_v44 = vpop.f32.mrf.mxu0  ;;  %v527_v58 = vpop.f32.mrf.mxu1  ;;  %v1332_v5 = vrot.slane %v1290_v3, 7  ;;  %v1316_v10 = vmax.f32 %v1281_v7, %v1290_v3 }
 0x11d   : > { %v528_v61 = vadd.f32 %v527_v58, %v412_v44 }
 0x11e   : > { %v1160_v59 = vadd.f32 %v1102_v56, %v855_v57  ;;  %v1349_v15 = vsel %vm1345_vm2, 0.0, %v1332_v5 }
 0x11f   : > { %v1357_v23 = vmax.f32 %v1316_v10, %v1349_v15 }
 0x120   : > { %v1196_v60 = vadd.f32 %v2180_v46, %v1160_v59 }
 0x122   : > { %v1228_v62 = vmax.f32 %v1196_v60, 0.0 }
 0x123   : > { %v800_v63 = vpop.f32.mrf.mxu2  ;;  %v1105_v52 = vpop.f32.mrf.mxu3  ;;  %v1299_v11 = vld [vmem:[#allocation2 + $0x70] sm:$0xff] }
 0x124   : > { %1261 = vst.msk [vmem:[#allocation2 + $0x78] sm:$0xff] %vm1245_vm1, %v1228_v62  ;;  %v856_v0 = vadd.f32 %v800_v63, %v528_v61  ;;  %v414_v1 = vpop.f32.mrf.mxu0  ;;  %v529_v2 = vpop.f32.mrf.mxu1 }
 0x125   : > { %v530_v9 = vadd.f32 %v529_v2, %v414_v1 }
 0x126   : > { %v1161_v4 = vadd.f32 %v1105_v52, %v856_v0 }
 0x128   : > { %v1197_v6 = vadd.f32 %v2180_v46, %v1161_v4 }
 0x12a   : > { %v1229_v8 = vmax.f32 %v1197_v6, 0.0 }
 0x12b   : > { %v1308_v12 = vld [vmem:[#allocation2 + $0x78] sm:$0xff]  ;;  %v802_v13 = vpop.f32.mrf.mxu2  ;;  %v1107_v14 = vpop.f32.mrf.mxu3 }
 0x12c   : > { %v1365_v16 = vmax.f32 %v1299_v11, %v1308_v12  ;;  %v1381_v17 = vrot.slane %v1308_v12, 7  ;;  %1262 = vst.msk [vmem:[#allocation2 + $0x80] sm:$0xff] %vm1245_vm1, %v1229_v8  ;;  %v857_v18 = vadd.f32 %v802_v13, %v530_v9  ;;  %v417_v19 = vpop.f32.mrf.mxu0  ;;  %v532_v20 = vpop.f32.mrf.mxu1 }
 0x12d   : > { %v533_v26 = vadd.f32 %v532_v20, %v417_v19 }
 0x12e   : > { %v1397_v21 = vsel %vm1345_vm2, 0.0, %v1381_v17  ;;  %v1162_v22 = vadd.f32 %v1107_v14, %v857_v18 }
 0x12f   : > { %v1405_v24 = vmax.f32 %v1365_v16, %v1397_v21 }
 0x130   : > { %v1198_v25 = vadd.f32 %v2180_v46, %v1162_v22 }
 0x131   : > { %v1413_v27 = vmax.f32 %v1357_v23, %v1405_v24 }
 0x132   : > { %v1230_v28 = vmax.f32 %v1198_v25, 0.0 }
 0x133   : > { %v1421_v29 = vmax.f32 %v1413_v27, %v2275_v37  ;;  %v805_v30 = vpop.f32.mrf.mxu2  ;;  %v1110_v31 = vpop.f32.mrf.mxu3  ;;  %v1282_v59 = vld [vmem:[#allocation2 + $0x80] sm:$0xff] }
 0x134   : > { %1263 = vst.msk [vmem:[#allocation2 + $0x88] sm:$0xff] %vm1245_vm1, %v1230_v28  ;;  %v858_v32 = vadd.f32 %v805_v30, %v533_v26  ;;  %v419_v33 = vpop.f32.mrf.mxu0  ;;  %v534_v34 = vpop.f32.mrf.mxu1 }
 0x135   : > { %1429 = vst.msk [vmem:[%s2223_s17 + $0x18] sm:$0xff] %vm1245_vm1, %v1421_v29  ;;  %v535_v39 = vadd.f32 %v534_v34, %v419_v33 }
 0x136   : > { %v1163_v35 = vadd.f32 %v1110_v31, %v858_v32 }
 0x138   : > { %v1199_v36 = vadd.f32 %v2180_v46, %v1163_v35 }
 0x13a   : > { %v1231_v38 = vmax.f32 %v1199_v36, 0.0 }
 0x13b   : > { %v807_v40 = vpop.f32.mrf.mxu2  ;;  %v1112_v41 = vpop.f32.mrf.mxu3  ;;  %v1291_v56 = vld [vmem:[#allocation2 + $0x88] sm:$0xff] }
 0x13c   : > { %1264 = vst.msk [vmem:[#allocation2 + $0x90] sm:$0xff] %vm1245_vm1, %v1231_v38  ;;  %v859_v42 = vadd.f32 %v807_v40, %v535_v39  ;;  %v422_v37 = vpop.f32.mrf.mxu0  ;;  %v537_v43 = vpop.f32.mrf.mxu1  ;;  %v1333_v44 = vrot.slane %v1291_v56, 7  ;;  %v1317_v62 = vmax.f32 %v1282_v59, %v1291_v56 }
 0x13d   : > { %v538_v48 = vadd.f32 %v537_v43, %v422_v37 }
 0x13e   : > { %v1164_v45 = vadd.f32 %v1112_v41, %v859_v42  ;;  %v1350_v2 = vsel %vm1345_vm2, 0.0, %v1333_v44 }
 0x13f   : > { %v1358_v10 = vmax.f32 %v1317_v62, %v1350_v2 }
 0x140   : > { %v1200_v47 = vadd.f32 %v2180_v46, %v1164_v45 }
 0x142   : > { %v1232_v49 = vmax.f32 %v1200_v47, 0.0 }
 0x143   : > { %v810_v50 = vpop.f32.mrf.mxu2  ;;  %v1115_v51 = vpop.f32.mrf.mxu3  ;;  %v1300_v63 = vld [vmem:[#allocation2 + $0x90] sm:$0xff] }
 0x144   : > { %1265 = vst.msk [vmem:[#allocation2 + $0x98] sm:$0xff] %vm1245_vm1, %v1232_v49  ;;  %v860_v53 = vadd.f32 %v810_v50, %v538_v48  ;;  %v424_v54 = vpop.f32.mrf.mxu0  ;;  %v539_v55 = vpop.f32.mrf.mxu1 }
 0x145   : > { %v540_v61 = vadd.f32 %v539_v55, %v424_v54 }
 0x146   : > { %v1165_v57 = vadd.f32 %v1115_v51, %v860_v53 }
 0x148   : > { %v1201_v58 = vadd.f32 %v2180_v46, %v1165_v57 }
 0x14a   : > { %v1233_v60 = vmax.f32 %v1201_v58, 0.0 }
 0x14b   : > { %v1309_v52 = vld [vmem:[#allocation2 + $0x98] sm:$0xff]  ;;  %v812_v0 = vpop.f32.mrf.mxu2  ;;  %v1117_v1 = vpop.f32.mrf.mxu3 }
 0x14c   : > { %v1366_v3 = vmax.f32 %v1300_v63, %v1309_v52  ;;  %v1382_v4 = vrot.slane %v1309_v52, 7  ;;  %1266 = vst.msk [vmem:[#allocation2 + $0xa0] sm:$0xff] %vm1245_vm1, %v1233_v60  ;;  %v861_v5 = vadd.f32 %v812_v0, %v540_v61  ;;  %v427_v6 = vpop.f32.mrf.mxu0  ;;  %v542_v7 = vpop.f32.mrf.mxu1 }
 0x14d   : > { %v543_v13 = vadd.f32 %v542_v7, %v427_v6 }
 0x14e   : > { %v1398_v8 = vsel %vm1345_vm2, 0.0, %v1382_v4  ;;  %v1166_v9 = vadd.f32 %v1117_v1, %v861_v5 }
 0x14f   : > { %v1406_v11 = vmax.f32 %v1366_v3, %v1398_v8 }
 0x150   : > { %v1202_v12 = vadd.f32 %v2180_v46, %v1166_v9 }
 0x151   : > { %v1414_v14 = vmax.f32 %v1358_v10, %v1406_v11 }
 0x152   : > { %v1234_v15 = vmax.f32 %v1202_v12, 0.0 }
 0x153   : > { %v1422_v16 = vmax.f32 %v1414_v14, %v1405_v24  ;;  %v815_v17 = vpop.f32.mrf.mxu2  ;;  %v1120_v18 = vpop.f32.mrf.mxu3  ;;  %v1283_v45 = vld [vmem:[#allocation2 + $0xa0] sm:$0xff] }
 0x154   : > { %1267 = vst.msk [vmem:[#allocation2 + $0xa8] sm:$0xff] %vm1245_vm1, %v1234_v15  ;;  %v862_v19 = vadd.f32 %v815_v17, %v543_v13  ;;  %v429_v20 = vpop.f32.mrf.mxu0  ;;  %v544_v21 = vpop.f32.mrf.mxu1 }
 0x155   : > { %1430 = vst.msk [vmem:[%s2223_s17 + $0x20] sm:$0xff] %vm1245_vm1, %v1422_v16  ;;  %v545_v26 = vadd.f32 %v544_v21, %v429_v20 }
 0x156   : > { %v1167_v22 = vadd.f32 %v1120_v18, %v862_v19 }
 0x158   : > { %v1203_v23 = vadd.f32 %v2180_v46, %v1167_v22 }
 0x15a   : > { %v1235_v25 = vmax.f32 %v1203_v23, 0.0 }
 0x15b   : > { %v817_v27 = vpop.f32.mrf.mxu2  ;;  %v1122_v28 = vpop.f32.mrf.mxu3  ;;  %v1292_v41 = vld [vmem:[#allocation2 + $0xa8] sm:$0xff] }
 0x15c   : > { %1268 = vst.msk [vmem:[#allocation2 + $0xb0] sm:$0xff] %vm1245_vm1, %v1235_v25  ;;  %v863_v29 = vadd.f32 %v817_v27, %v545_v26  ;;  %v432_v24 = vpop.f32.mrf.mxu0  ;;  %v547_v30 = vpop.f32.mrf.mxu1  ;;  %v1334_v37 = vrot.slane %v1292_v41, 7  ;;  %v1318_v49 = vmax.f32 %v1283_v45, %v1292_v41 }
 0x15d   : > { %v548_v33 = vadd.f32 %v547_v30, %v432_v24 }
 0x15e   : > { %v1168_v31 = vadd.f32 %v1122_v28, %v863_v29  ;;  %v1351_v55 = vsel %vm1345_vm2, 0.0, %v1334_v37 }
 0x15f   : > { %v1359_v62 = vmax.f32 %v1318_v49, %v1351_v55 }
 0x160   : > { %v1204_v32 = vadd.f32 %v2180_v46, %v1168_v31 }
 0x162   : > { %v1236_v34 = vmax.f32 %v1204_v32, 0.0 }
 0x163   : > { %v820_v35 = vpop.f32.mrf.mxu2  ;;  %v1125_v36 = vpop.f32.mrf.mxu3  ;;  %v1301_v50 = vld [vmem:[#allocation2 + $0xb0] sm:$0xff] }
 0x164   : > { %1269 = vst.msk [vmem:[#allocation2 + $0xb8] sm:$0xff] %vm1245_vm1, %v1236_v34  ;;  %v864_v38 = vadd.f32 %v820_v35, %v548_v33  ;;  %v434_v39 = vpop.f32.mrf.mxu0  ;;  %v549_v40 = vpop.f32.mrf.mxu1 }
 0x165   : > { %v550_v48 = vadd.f32 %v549_v40, %v434_v39 }
 0x166   : > { %v1169_v42 = vadd.f32 %v1125_v36, %v864_v38 }
 0x168   : > { %v1205_v43 = vadd.f32 %v2180_v46, %v1169_v42 }
 0x16a   : > { %v1237_v47 = vmax.f32 %v1205_v43, 0.0 }
 0x16b   : > { %v1310_v51 = vld [vmem:[#allocation2 + $0xb8] sm:$0xff]  ;;  %v822_v53 = vpop.f32.mrf.mxu2  ;;  %v1127_v54 = vpop.f32.mrf.mxu3 }
 0x16c   : > { %v1367_v56 = vmax.f32 %v1301_v50, %v1310_v51  ;;  %v1383_v57 = vrot.slane %v1310_v51, 7  ;;  %1270 = vst.msk [vmem:[#allocation2 + $0xc0] sm:$0xff] %vm1245_vm1, %v1237_v47  ;;  %v865_v44 = vadd.f32 %v822_v53, %v550_v48  ;;  %v437_v58 = vpop.f32.mrf.mxu0  ;;  %v552_v59 = vpop.f32.mrf.mxu1 }
 0x16d   : > { %v553_v0 = vadd.f32 %v552_v59, %v437_v58 }
 0x16e   : > { %v1399_v60 = vsel %vm1345_vm2, 0.0, %v1383_v57  ;;  %v1170_v61 = vadd.f32 %v1127_v54, %v865_v44 }
 0x16f   : > { %v1407_v63 = vmax.f32 %v1367_v56, %v1399_v60 }
 0x170   : > { %v1206_v52 = vadd.f32 %v2180_v46, %v1170_v61 }
 0x171   : > { %v1415_v1 = vmax.f32 %v1359_v62, %v1407_v63 }
 0x172   : > { %v1238_v2 = vmax.f32 %v1206_v52, 0.0 }
 0x173   : > { %v1423_v3 = vmax.f32 %v1415_v1, %v1406_v11  ;;  %v825_v4 = vpop.f32.mrf.mxu2  ;;  %v1130_v5 = vpop.f32.mrf.mxu3  ;;  %v1284_v31 = vld [vmem:[#allocation2 + $0xc0] sm:$0xff] }
 0x174   : > { %1271 = vst.msk [vmem:[#allocation2 + $0xc8] sm:$0xff] %vm1245_vm1, %v1238_v2  ;;  %v866_v6 = vadd.f32 %v825_v4, %v553_v0  ;;  %v439_v7 = vpop.f32.mrf.mxu0  ;;  %v554_v8 = vpop.f32.mrf.mxu1 }
 0x175   : > { %1431 = vst.msk [vmem:[%s2223_s17 + $0x28] sm:$0xff] %vm1245_vm1, %v1423_v3  ;;  %v555_v13 = vadd.f32 %v554_v8, %v439_v7 }
 0x176   : > { %v1171_v9 = vadd.f32 %v1130_v5, %v866_v6 }
 0x178   : > { %v1207_v10 = vadd.f32 %v2180_v46, %v1171_v9 }
 0x17a   : > { %v1239_v12 = vmax.f32 %v1207_v10, 0.0 }
 0x17b   : > { %v827_v14 = vpop.f32.mrf.mxu2  ;;  %v1132_v15 = vpop.f32.mrf.mxu3  ;;  %v1293_v28 = vld [vmem:[#allocation2 + $0xc8] sm:$0xff] }
 0x17c   : > { %1272 = vst.msk [vmem:[#allocation2 + $0xd0] sm:$0xff] %vm1245_vm1, %v1239_v12  ;;  %v867_v16 = vadd.f32 %v827_v14, %v555_v13  ;;  %v442_v11 = vpop.f32.mrf.mxu0  ;;  %v557_v17 = vpop.f32.mrf.mxu1  ;;  %v1335_v24 = vrot.slane %v1293_v28, 7  ;;  %v1319_v34 = vmax.f32 %v1284_v31, %v1293_v28 }
 0x17d   : > { %v558_v20 = vadd.f32 %v557_v17, %v442_v11 }
 0x17e   : > { %v1172_v18 = vadd.f32 %v1132_v15, %v867_v16  ;;  %v1352_v40 = vsel %vm1345_vm2, 0.0, %v1335_v24 }
 0x17f   : > { %v1360_v49 = vmax.f32 %v1319_v34, %v1352_v40 }
 0x180   : > { %v1208_v19 = vadd.f32 %v2180_v46, %v1172_v18 }
 0x182   : > { %v1240_v21 = vmax.f32 %v1208_v19, 0.0 }
 0x183   : > { %v830_v22 = vpop.f32.mrf.mxu2  ;;  %v1135_v23 = vpop.f32.mrf.mxu3  ;;  %v1302_v35 = vld [vmem:[#allocation2 + $0xd0] sm:$0xff] }
 0x184   : > { %1273 = vst.msk [vmem:[#allocation2 + $0xd8] sm:$0xff] %vm1245_vm1, %v1240_v21  ;;  %v868_v25 = vadd.f32 %v830_v22, %v558_v20  ;;  %v444_v26 = vpop.f32.mrf.mxu0  ;;  %v559_v27 = vpop.f32.mrf.mxu1 }
 0x185   : > { %v560_v33 = vadd.f32 %v559_v27, %v444_v26 }
 0x186   : > { %v1173_v29 = vadd.f32 %v1135_v23, %v868_v25 }
 0x188   : > { %v1209_v30 = vadd.f32 %v2180_v46, %v1173_v29 }
 0x18a   : > { %v1241_v32 = vmax.f32 %v1209_v30, 0.0 }
 0x18b   : > { %v1311_v36 = vld [vmem:[#allocation2 + $0xd8] sm:$0xff]  ;;  %v832_v38 = vpop.f32.mrf.mxu2  ;;  %v1137_v39 = vpop.f32.mrf.mxu3 }
 0x18c   : > { %v1368_v41 = vmax.f32 %v1302_v35, %v1311_v36  ;;  %v1384_v42 = vrot.slane %v1311_v36, 7  ;;  %1274 = vst.msk [vmem:[#allocation2 + $0xe0] sm:$0xff] %vm1245_vm1, %v1241_v32  ;;  %v869_v37 = vadd.f32 %v832_v38, %v560_v33  ;;  %v447_v43 = vpop.f32.mrf.mxu0  ;;  %v562_v45 = vpop.f32.mrf.mxu1 }
 0x18d   : > { %v563_v53 = vadd.f32 %v562_v45, %v447_v43 }
 0x18e   : > { %v1400_v47 = vsel %vm1345_vm2, 0.0, %v1384_v42  ;;  %v1174_v48 = vadd.f32 %v1137_v39, %v869_v37 }
 0x18f   : > { %v1408_v50 = vmax.f32 %v1368_v41, %v1400_v47 }
 0x190   : > { %v1210_v51 = vadd.f32 %v2180_v46, %v1174_v48 }
 0x191   : > { %v1416_v54 = vmax.f32 %v1360_v49, %v1408_v50 }
 0x192   : > { %v1242_v55 = vmax.f32 %v1210_v51, 0.0 }
 0x193   : > { %v1424_v56 = vmax.f32 %v1416_v54, %v1407_v63  ;;  %v835_v57 = vpop.f32.mrf.mxu2  ;;  %v1140_v44 = vpop.f32.mrf.mxu3  ;;  %v1285_v8 = vld [vmem:[#allocation2 + $0xe0] sm:$0xff] }
 0x194   : > { %1275 = vst.msk [vmem:[#allocation2 + $0xe8] sm:$0xff] %vm1245_vm1, %v1242_v55  ;;  %v870_v58 = vadd.f32 %v835_v57, %v563_v53  ;;  %v449_v60 = vpop.f32.mrf.mxu0  ;;  %v564_v61 = vpop.f32.mrf.mxu1 }
 0x195   : > { %1432 = vst.msk [vmem:[%s2223_s17 + $0x30] sm:$0xff] %vm1245_vm1, %v1424_v56  ;;  %v565_v0 = vadd.f32 %v564_v61, %v449_v60 }
 0x196   : > { %v1175_v59 = vadd.f32 %v1140_v44, %v870_v58 }
 0x198   : > { %v1211_v62 = vadd.f32 %v2180_v46, %v1175_v59 }
 0x19a   : > { %v1243_v52 = vmax.f32 %v1211_v62, 0.0 }
 0x19b   : > { %v837_v1 = vpop.f32.mrf.mxu2  ;;  %v1142_v63 = vpop.f32.mrf.mxu3  ;;  %v1294_v6 = vld [vmem:[#allocation2 + $0xe8] sm:$0xff] }
 0x19c   : > { %1276 = vst.msk [vmem:[#allocation2 + $0xf0] sm:$0xff] %vm1245_vm1, %v1243_v52  ;;  %v871_v2 = vadd.f32 %v837_v1, %v565_v0  ;;  %v1336_v7 = vrot.slane %v1294_v6, 7  ;;  %v1320_v9 = vmax.f32 %v1285_v8, %v1294_v6 }
 0x19e   : > { %v1176_v3 = vadd.f32 %v1142_v63, %v871_v2  ;;  %v1353_v13 = vsel %vm1345_vm2, 0.0, %v1336_v7 }
 0x19f   : > { %v1361_v16 = vmax.f32 %v1320_v9, %v1353_v13 }
 0x1a0   : > { %v1212_v4 = vadd.f32 %v2180_v46, %v1176_v3 }
 0x1a2   : > { %v1244_v5 = vmax.f32 %v1212_v4, 0.0 }
 0x1a3   : > { %v1303_v10 = vld [vmem:[#allocation2 + $0xf0] sm:$0xff] }
 0x1a4   : > { %1277 = vst.msk [vmem:[#allocation2 + $0xf8] sm:$0xff] %vm1245_vm1, %v1244_v5 }
 0x1ab   : > { %v1312_v12 = vld [vmem:[#allocation2 + $0xf8] sm:$0xff] }
 0x1ac   : > { %v1369_v14 = vmax.f32 %v1303_v10, %v1312_v12  ;;  %v1385_v15 = vrot.slane %v1312_v12, 7 }
 0x1ae   : > { %v1401_v46 = vsel %vm1345_vm2, 0.0, %v1385_v15 }
 0x1af   : > { %v1409_v11 = vmax.f32 %v1369_v14, %v1401_v46 }
 0x1b1   : > { %v1417_v17 = vmax.f32 %v1361_v16, %v1409_v11 }
 0x1b3   : > { %v1425_v18 = vmax.f32 %v1417_v17, %v1408_v50 }
 0x1b5   : > { %1433 = vst.msk [vmem:[%s2223_s17 + $0x38] sm:$0xff] %vm1245_vm1, %v1425_v18 }
 0x1b6   : > { %1963 = shalt.err (!%p1960_p3)
}
 0x1b7   : > { %s2000_s8 = smov 128   ;;  %s2001_s9 = smov 8  }
 0x1b8   : > { %1894 = dma.vmem_to_hbm [thread:$0]  (%p2060_p5), %s1448_s16, 1024, %s1450_s26, %s1435_s27, %s2000_s8, %s2000_s8, %s2001_s9  }
 0x1b9 PF: > { %p1900_p4 = scmp.ge.s32.totalorder %s1998_s15, 2  ;;  %s1464_s10 = sand.u32 1, %s1986_s12  }
 0x1ba   : > { %s1465_s11 = scalar_lea.sflag [#allocation4], %s1464_s10 }
 0x1bb   : > { %p1897_p7 = pnand %p1900_p4, %p2064_p6 }
 0x1bd   : > { %p1898_p8 = pneg %p1897_p7 }
 0x1bf   : > { %1981 = dma.done.wait (%p1898_p8), %s1465_s11, 1024  }
 0x1c0   : > { %1983 = vsyncadd (%p1898_p8), %s1465_s11, 4294966272  ;;  %p13_p9 = scmp.ge.s32.totalorder %s2047_s18, 4   ;;  %s2384_s12 = smov %s1990_s13 }
 0x1c1   : > { %s2385_s13 = smov %s1994_s14  ;;  %s2386_s14 = smov %s2058_s21 }
 0x1c2   : > { %s2387_s15 = smov %s2047_s18  ;;  %15 = sbr.rel (!%p13_p9) target bundleno = 3 (0x3), region = 70 }
 0x1c7   :  { %1471 = vsyncpa [#allocation4], 1 }
 0x1c8   :  { %1473 = vsyncpa [#allocation4 + $0x1], 1 }

</bundles_post_ra>
